<compile_context>
chip_gen: v6e
topology: v6e:2x2x1
jax: 0.10.0
libtpu: 0.0.40
codegen_flags: <defaults>
</compile_context>

<pallas_src>
import math

import jax
import jax.numpy as jnp
from jax import lax
from jax.experimental import pallas as pl
from jax.experimental.pallas import tpu as pltpu

KSIZE = 3
NTAPS = KSIZE * KSIZE
# Tap order matches the torch conv2d kernel layout: k = ky*3 + kx, (dy, dx) = (ky-1, kx-1).
OFFSETS = [(dy, dx) for dy in (-1, 0, 1) for dx in (-1, 0, 1)]

_ROLL_IS_JNP = None


def _roll_convention_is_jnp():
    """One-time probe of pltpu.roll's rotation direction (vs jnp.roll)."""
    global _ROLL_IS_JNP
    if _ROLL_IS_JNP is None:
        def k(x_ref, o_ref):
            o_ref[...] = pltpu.roll(x_ref[...], 3, axis=0)

        x = jnp.arange(8 * 128, dtype=jnp.float32).reshape(8, 128)
        y = pl.pallas_call(k, out_shape=jax.ShapeDtypeStruct((8, 128), jnp.float32))(x)
        if bool(jnp.array_equal(y, jnp.roll(x, 3, axis=0))):
            _ROLL_IS_JNP = True
        else:
            assert bool(jnp.array_equal(y, jnp.roll(x, -3, axis=0))), \
                "unexpected pltpu.roll semantics"
            _ROLL_IS_JNP = False
    return _ROLL_IS_JNP


# ------------------------------ Pallas kernel ------------------------------- #
def _build_kernel(H, W, hidden_channels, n_steps, out_step, roll_is_jnp):
    """Builds the fused ConvLSTM kernel body (one batch element per grid step)."""
    HW = H * W
    NL = len(hidden_channels)

    def fill_tap_slab(img, masks_ref, slab_ref):
        # img: (HW, C) f32, row-major flattened pixels (r = y*W + x).
        # Builds the 9 shifted+masked taps ('same' zero padding), concatenates
        # them and writes the bf16 slab with ONE lane-dense full-width store.
        parts = []
        for k, (dy, dx) in enumerate(OFFSETS):
            off = dy * W + dx                               # flattened-pixel offset
            if off == 0:
                shifted = img
            else:
                shift = ((-off) if roll_is_jnp else off) % HW
                shifted = pltpu.roll(img, shift, axis=0)
            parts.append(shifted * masks_ref[k])            # masks_ref[k]: (HW, 1)
        slab_ref[...] = jnp.concatenate(parts, axis=-1).astype(slab_ref.dtype)

    def lstm_gates(acc, c_prev, ch):
        # acc: (HW, 4*ch) f32 pre-activation, gate order [i, f, g, o].
        # Peephole terms are dropped: torch's init_hidden builds Wci/Wcf/Wco
        # as zeros, so c*Wci etc. are identically zero.
        # TODO(synk): re-add the c_prev * Wc{i,f,o} terms if trained non-zero
        # peephole weights ever need to be imported.
        xi = acc[:, 0 * ch:1 * ch]
        xf = acc[:, 1 * ch:2 * ch]
        xg = acc[:, 2 * ch:3 * ch]
        xo = acc[:, 3 * ch:4 * ch]
        if c_prev is None:                                  # first step: h = c = 0
            ci = jax.nn.sigmoid(xi)
            cc = ci * jnp.tanh(xg)
        else:
            ci = jax.nn.sigmoid(xi)
            cf = jax.nn.sigmoid(xf)
            cc = cf * c_prev + ci * jnp.tanh(xg)
        co = jax.nn.sigmoid(xo)
        return co * jnp.tanh(cc), cc

    def kernel(x_taps_ref, masks_ref, wx0_ref, b0_ref, *args):
        whx_refs = args[:NL]                                # fused [Wh_l | Wx_{l+1}] (bf16)
        bh_refs = args[NL:2 * NL - 1]                       # hidden-layer biases (1, 4*ch)
        out_ref = args[2 * NL - 1]
        scr = args[2 * NL:]
        c_scr = [scr[4 * l + 0] for l in range(NL)]         # cell state, f32
        slab_scr = [scr[4 * l + 1] for l in range(NL)]      # im2col'd h taps, bf16
        whh_scr = [scr[4 * l + 2] for l in range(NL)]       # Wh*h(s-1) stash, f32
        xb_scr = [scr[4 * l + 3] for l in range(NL)]        # step-invariant x-side term

        # ---- step-invariant work, done once per batch element ----
        # Layer 0: the input image never changes across steps -> Wx*x + b once.
        # Hidden layers: bias broadcast hoisted (JAX does not CSE
        # broadcast_in_dim).  Stashing in VMEM scratch bounds live ranges
        # across the statically unrolled step loop.
        xb_scr[0][...] = (
            jnp.dot(x_taps_ref[...], wx0_ref[...],
                    preferred_element_type=jnp.float32) + b0_ref[...])
        for l in range(1, NL):
            xb_scr[l][...] = jnp.broadcast_to(
                bh_refs[l - 1][...], (HW, 4 * hidden_channels[l]))

        h_last = None
        # TODO(synk): convert to lax.fori_loop with scratch-carried state if
        # n_steps ever grows past ~4 (code-size / live-range blowup).
        for s in range(n_steps):                            # static unroll (n_steps <= 3)
            xpart = None                                    # Wx_l . h_{l-1}(s) from prev layer
            for l in range(NL):
                ch = hidden_channels[l]
                acc = xb_scr[l][...]
                if xpart is not None:
                    acc = acc + xpart
                if s > 0:
                    acc = acc + whh_scr[l][...]
                    c_prev = c_scr[l][...]
                else:
                    c_prev = None                           # h == c == 0 at step 0
                h_new, c_new = lstm_gates(acc, c_prev, ch)
                c_scr[l][...] = c_new

                last_layer = (l + 1 == NL)
                last_step = (s + 1 == n_steps)
                xpart = None
                if not (last_layer and last_step):
                    # This layer's h-tap slab feeds (a) the next layer's input
                    # conv this step and (b) this layer's recurrence next step;
                    # both come from ONE fused MXU matmul over the bf16 slab.
                    fill_tap_slab(h_new, masks_ref, slab_scr[l])
                    slab = slab_scr[l][...]
                    whx = whx_refs[l]
                    if last_layer:                          # only own recurrence needed
                        whh_scr[l][...] = jnp.dot(
                            slab, whx[...], preferred_element_type=jnp.float32)
                    elif last_step:                         # only next layer's xconv needed
                        ch_nxt = hidden_channels[l + 1]
                        xpart = jnp.dot(slab, whx[:, pl.ds(4 * ch, 4 * ch_nxt)],
                                        preferred_element_type=jnp.float32)
                    else:                                   # both, in one MXU pass
                        fused = jnp.dot(slab, whx[...],
                                        preferred_element_type=jnp.float32)
                        whh_scr[l][...] = fused[:, :4 * ch]
                        xpart = fused[:, 4 * ch:]
                if last_layer:
                    h_last = h_new
            if s == out_step:
                # TODO(synk): for ch_last < 128 a lane-dense (HW*ch/128, 128)
                # output slab would avoid masked partial stores; skipped here
                # since this write is a one-time 32 KiB per batch element.
                out_ref[...] = h_last.astype(out_ref.dtype)

    return kernel


# ------------------------------- glue / wrapper ----------------------------- #
def _im2col_taps(x_nhwc):
    """(B, H, W, C) -> (B, H*W, 9*C); columns tap-major, matching OFFSETS order."""
    B, H, W, C = x_nhwc.shape
    xp = jnp.pad(x_nhwc, ((0, 0), (1, 1), (1, 1), (0, 0)))
    cols = [xp[:, ky:ky + H, kx:kx + W, :].reshape(B, H * W, C)
            for ky in range(KSIZE) for kx in range(KSIZE)]
    return jnp.concatenate(cols, axis=-1)


def _tap_masks(H, W):
    """(NTAPS, H*W, 1) f32, tap-major: mask[k, r] == 1 iff pixel r + offset_k is in-bounds."""
    yy, xx = jnp.meshgrid(jnp.arange(H), jnp.arange(W), indexing="ij")
    yy, xx = yy.reshape(-1), xx.reshape(-1)
    rows = [((yy + dy >= 0) & (yy + dy < H) & (xx + dx >= 0) & (xx + dx < W))
            for dy, dx in OFFSETS]
    return jnp.stack(rows, axis=0).astype(jnp.float32)[:, :, None]


def convlstm_forward(x_nchw, layer_params, hidden_channels,
                     step=3, effective_step=(2,)):
    """Replicates ConvLSTM.forward (which returns outputs[0]) with one pallas_call."""
    x_nhwc = jnp.transpose(x_nchw, (0, 2, 3, 1)).astype(jnp.float32)
    B, H, W, Cin = x_nhwc.shape
    HW = H * W
    NL = len(hidden_channels)
    ch_last = hidden_channels[-1]

    eff = sorted(e for e in effective_step if e < step)
    assert eff, "effective_step must contain an index < step"
    out_step = eff[0]              # ConvLSTM.forward returns outputs[0] only
    n_steps = out_step + 1         # later steps cannot affect the returned tensor

    x_taps0 = _im2col_taps(x_nhwc).astype(jnp.bfloat16)     # one-time, step-invariant
    masks = _tap_masks(H, W)

    # bf16 weights for the MXU; hidden-side RHS pre-fused as [Wh_l | Wx_{l+1}].
    wx0 = layer_params[0]["wx"].astype(jnp.bfloat16)
    whx = []
    for l in range(NL):
        wh_l = layer_params[l]["wh"]
        if l + 1 < NL:
            whx.append(jnp.concatenate([wh_l, layer_params[l + 1]["wx"]],
                                       axis=1).astype(jnp.bfloat16))
        else:
            whx.append(wh_l.astype(jnp.bfloat16))

    operands = [x_taps0, masks, wx0, layer_params[0]["b"]]
    in_specs = [
        pl.BlockSpec((None, HW, NTAPS * Cin), lambda b: (b, 0, 0)),
        pl.BlockSpec((NTAPS, HW, 1), lambda b: (0, 0, 0)),
        pl.BlockSpec((NTAPS * Cin, 4 * hidden_channels[0]), lambda b: (0, 0)),
        pl.BlockSpec((1, 4 * hidden_channels[0]), lambda b: (0, 0)),
    ]
    for l in range(NL):
        operands.append(whx[l])
        in_specs.append(pl.BlockSpec(whx[l].shape, lambda b: (0, 0)))
    for l in range(1, NL):
        operands.append(layer_params[l]["b"])
        in_specs.append(pl.BlockSpec((1, 4 * hidden_channels[l]), lambda b: (0, 0)))

    scratch = []
    for l in range(NL):
        ch = hidden_channels[l]
        scratch += [
            pltpu.VMEM((HW, ch), jnp.float32),               # cell state c
            pltpu.VMEM((HW, NTAPS * ch), jnp.bfloat16),      # im2col'd h taps (MXU LHS only)
            pltpu.VMEM((HW, 4 * ch), jnp.float32),           # Wh*h stash (consumed next step)
            pltpu.VMEM((HW, 4 * ch), jnp.float32),           # hoisted x-side term / bias
        ]

    kernel = _build_kernel(H, W, list(hidden_channels), n_steps, out_step,
                           _roll_convention_is_jnp())

    out = pl.pallas_call(
        kernel,
        out_shape=jax.ShapeDtypeStruct((B, HW, ch_last), jnp.float32),
        grid=(B,),
        in_specs=in_specs,
        out_specs=pl.BlockSpec((None, HW, ch_last), lambda b: (b, 0, 0)),
        scratch_shapes=scratch,
        compiler_params=pltpu.CompilerParams(
            # Batch elements are independent -> shard across TensorCores (v7x);
            # neutral on single-TC v5e/v6e.
            dimension_semantics=("parallel",)),
        # TODO(synk): for production BCDU-Net sizes (e.g. 128x128 spatial,
        # ch=64/128) add an HW row-block grid axis with a 1-row halo per step,
        # stream c/slab per row-block, and set vmem_limit_bytes per generation
        # (~48 MiB usable on v7x's 64 MiB VMEM, up to ~100 MiB on v5e/v6e);
        # the fully resident per-layer state does not fit v7x VMEM at those
        # shapes (and blows the 16/32 MiB default scoped limit on v5e/v6e).
    )(*operands)

    return jnp.transpose(out.reshape(B, H, W, ch_last), (0, 3, 1, 2))


def init_cell_params(key, cin, ch):
    """Synthetic params matching torch ConvLSTMCell, packed for the fused matmul.

    Each nn.Conv2d weight (ch, in, 3, 3) is repacked with rows (tap*in + c_in)
    and the four gates [i, f, g(c), o] concatenated on the output/lane axis, so
    a 3x3 'same' conv becomes one (HW, 9*in) @ (9*in, 4*ch) matmul.  Peephole
    weights Wci/Wcf/Wco are zeros (torch init_hidden) and therefore omitted.
    """
    keys = jax.random.split(key, 12)

    def conv_w(k, in_ch):
        bound = 1.0 / math.sqrt(in_ch * KSIZE * KSIZE)
        return jax.random.uniform(k, (ch, in_ch, KSIZE, KSIZE), jnp.float32,
                                  -bound, bound)

    def conv_b(k, in_ch):
        bound = 1.0 / math.sqrt(in_ch * KSIZE * KSIZE)
        return jax.random.uniform(k, (ch,), jnp.float32, -bound, bound)

    wxi, wxf, wxc, wxo = (conv_w(keys[i], cin) for i in range(4))
    whi, whf, whc, who = (conv_w(keys[4 + i], ch) for i in range(4))
    bxi, bxf, bxc, bxo = (conv_b(keys[8 + i], cin) for i in range(4))

    def pack(gate_ws):
        mats = [jnp.transpose(w, (2, 3, 1, 0)).reshape(NTAPS * w.shape[1], ch)
                for w in gate_ws]
        return jnp.concatenate(mats, axis=-1)                # (9*in, 4*ch), f32

    wx = pack([wxi, wxf, wxc, wxo])
    wh = pack([whi, whf, whc, who])
    b = jnp.concatenate([bxi, bxf, bxc, bxo])[None, :]       # (1, 4*ch)
    return dict(wx=wx, wh=wh, b=b)


def _reference_forward(x_nchw, layer_params, hidden_channels,
                       step=3, effective_step=(2,)):
    """Pure-JAX f32 reference of ConvLSTM.forward (independent of pltpu.roll)."""
    x_nhwc = jnp.transpose(x_nchw, (0, 2, 3, 1)).astype(jnp.float32)
    B, H, W, _ = x_nhwc.shape
    HW = H * W
    NL = len(hidden_channels)
    hi = lax.Precision.HIGHEST
    h = [jnp.zeros((B, HW, hc), jnp.float32) for hc in hidden_channels]
    c = [jnp.zeros((B, HW, hc), jnp.float32) for hc in hidden_channels]
    outputs = []
    for s in range(step):
        xin = x_nhwc
        for l in range(NL):
            hc = hidden_channels[l]
            p = layer_params[l]
            x_taps = _im2col_taps(xin)
            h_taps = _im2col_taps(h[l].reshape(B, H, W, hc))
            acc = (jnp.matmul(x_taps, p["wx"], precision=hi)
                   + jnp.matmul(h_taps, p["wh"], precision=hi) + p["b"])
            ci = jax.nn.sigmoid(acc[..., 0 * hc:1 * hc])
            cf = jax.nn.sigmoid(acc[..., 1 * hc:2 * hc])
            cg = jnp.tanh(acc[..., 2 * hc:3 * hc])
            co = jax.nn.sigmoid(acc[..., 3 * hc:4 * hc])
            cc = cf * c[l] + ci * cg
            h[l] = co * jnp.tanh(cc)
            c[l] = cc
            xin = h[l].reshape(B, H, W, hc)
        if s in effective_step:
            outputs.append(h[NL - 1])
    out = outputs[0]
    return jnp.transpose(out.reshape(B, H, W, hidden_channels[-1]), (0, 3, 1, 2))


if __name__ == "__main__":
    key = jax.random.PRNGKey(0)
    B, Cin, H, W = 2, 4, 16, 16
    hidden_channels = [32, 32]          # module asserts hidden % 2 == 0
    step, effective_step = 3, (2,)
    input_channels = [Cin] + hidden_channels

    k_in, *k_layers = jax.random.split(key, 1 + len(hidden_channels))
    x = jax.random.normal(k_in, (B, Cin, H, W), jnp.float32)
    params = [init_cell_params(k_layers[i], input_channels[i], hidden_channels[i])
              for i in range(len(hidden_channels))]

    _roll_convention_is_jnp()           # resolve the roll-direction probe outside jit

    fwd = jax.jit(lambda xx: convlstm_forward(xx, params, hidden_channels,
                                              step=step,
                                              effective_step=effective_step))
    out = jax.block_until_ready(fwd(x))
    assert out.shape == (B, hidden_channels[-1], H, W)
    assert bool(jnp.all(jnp.isfinite(out)))

    # Validate against an f32 pure-JAX reference (tolerance covers the bf16
    # tap/weight rounding used for the MXU matmuls over the 3-step recurrence).
    ref = _reference_forward(x, params, hidden_channels,
                             step=step, effective_step=effective_step)
    max_err = float(jnp.max(jnp.abs(out - ref)))
    assert max_err < 7.5e-2, f"kernel vs f32 reference: max|diff| = {max_err}"
    print("KERNEL_OK")
</pallas_src>

<mosaic_0001>
module attributes {stable_mosaic.version = 11 : i64} {
  func.func @k(%arg0: memref<8x128xf32, #tpu.memory_space<vmem>>, %arg1: memref<8x128xf32, #tpu.memory_space<vmem>>) attributes {dimension_semantics = [], scalar_prefetch = 0 : i64, scratch_operands = 0 : i64, tpu.core_type = #tpu.core_type<tc>} {
    %c0 = arith.constant 0 : index
    %c0_0 = arith.constant 0 : index
    %0 = vector.load %arg0[%c0, %c0_0] : memref<8x128xf32, #tpu.memory_space<vmem>>, vector<8x128xf32>
    %c3_i32 = arith.constant 3 : i32
    %1 = tpu.dynamic_rotate %0 by %c3_i32 dim 0 : vector<8x128xf32>, i32 -> vector<8x128xf32>
    %c0_1 = arith.constant 0 : index
    %c0_2 = arith.constant 0 : index
    %2 = vector.load %arg1[%c0_1, %c0_2] : memref<8x128xf32, #tpu.memory_space<vmem>>, vector<8x128xf32>
    tpu.vector_store %arg1[%c0_1, %c0_2], %1 {strides = array<i32>} : memref<8x128xf32, #tpu.memory_space<vmem>>, vector<8x128xf32>,
    return
  }
}

</mosaic_0001>

<bundles_post_ra>
// kernel: tpu_custom_call.1
= control target key start
LH: loop header
LB: loop body
LE: loop exit
PB: predicated region body
PF: predicated region fallthrough
CT: control target
= control target key end

     0   :  { %6 = vsyncpa [#allocation3], 0  ;;  %s103_s0 = inlined_call_operand.hbm [shape: f32[8,128], index: 0, kind: input, shape index: {}]   ;;  %s104_s1 = inlined_call_operand.hbm [shape: f32[8,128], index: 1, kind: output, shape index: {}]  }
   0x1   :  { %7 = vsyncpa [#allocation4], 0  ;;  %s85_s6 = smov [#allocation2]  }
   0x2   :  { %s14_s7 = sshll.u32 %s85_s6, 4  ;;  %s15_s7 = int_to_ptr.vmem [resolvable:$true] %s14_s7 }
   0x3   :  { %s49_s8 = scalar_lea.vmem %s15_s7, 128  ;;  %p54_p1 = scmp.lt.s32.totalorder %s15_s7, %s15_s7 }
   0x4   :  { %p50_p0 = scmp.ne.s32.totalorder %s15_s7, %s49_s8  ;;  %p55_p2 = scmp.lt.s32.totalorder %s49_s8, %s49_s8 }
   0x6   :  { %p56_p3 = por %p55_p2, %p54_p1 }
   0x8   :  { %p57_p4 = pnand %p56_p3, %p50_p0 }
   0xa   :  { %60 = shalt.err (!%p57_p4)
}
   0xb   :  { %17 = dma.hbm_to_vmem [thread:$0]  %s103_s0, 128, %s15_s7, [#allocation3]  }
   0xc   :  { %81 = dma.done.wait [#allocation3], 128  }
   0xd   :  { %82 = vsyncadd [#allocation3], 4294967168  ;;  %s86_s11 = smov [#allocation5]   ;;  %v21_v0 = vld [vmem:[#allocation2] sm:$0xff] }
   0xe   :  { %s30_s12 = sshll.u32 %s86_s11, 4  ;;  %v22_v1 = vrot.slane %v21_v0, 5  ;;  %s31_s12 = int_to_ptr.vmem [resolvable:$true] %s30_s12 }
   0xf   :  { %s61_s13 = scalar_lea.vmem %s31_s12, 128  ;;  %p66_p6 = scmp.lt.s32.totalorder %s31_s12, %s31_s12 }
  0x10   :  { %23 = vst [vmem:[#allocation5] sm:$0xff] %v22_v1  ;;  %p62_p5 = scmp.ne.s32.totalorder %s31_s12, %s61_s13  ;;  %p67_p7 = scmp.lt.s32.totalorder %s61_s13, %s61_s13 }
  0x12   :  { %p68_p8 = por %p67_p7, %p66_p6 }
  0x14   :  { %p69_p9 = pnand %p68_p8, %p62_p5 }
  0x16   :  { %72 = shalt.err (!%p69_p9)
}
  0x17   :  { %33 = dma.vmem_to_hbm [thread:$0]  %s31_s12, 128, %s104_s1, [#allocation4]  }
  0x18   :  { %83 = dma.done.wait [#allocation4], 128  }
  0x19   :  { %84 = vsyncadd [#allocation4], 4294967168 }
  0x1a   :  { %37 = vsyncpa [#allocation3], 1 }
  0x1b   :  { %38 = vsyncpa [#allocation4], 1 }

</bundles_post_ra>
